<compile_context>
chip_gen: v5e
topology: v5e:2x2
jax: 0.10.0
libtpu: 0.0.40
codegen_flags: <defaults>
</compile_context>

<pallas_src>
import jax
import jax.numpy as jnp
from jax.experimental import pallas as pl
from jax.experimental.pallas import tpu as pltpu


def _pointwise_conv_nchw_kernel(x_ref, w_ref, b_ref, o_ref):
    # x_ref: (Cin, t_hw)   one batch element's tile of flattened pixels
    # w_ref: (Cout, Cin)   constant across the grid
    # b_ref: (Cout, 1)     constant across the grid
    # o_ref: (Cout, t_hw)  lane-dense output tile
    x = x_ref[...]
    w = w_ref[...]
    if x.dtype != w.dtype:
        # In-kernel cast (VPU) — avoids an extra wrapper-side HBM pass.
        x = x.astype(w.dtype)
    acc = jnp.dot(w, x, preferred_element_type=jnp.float32)
    o_ref[...] = (acc + b_ref[...]).astype(o_ref.dtype)


def pointwise_conv_nchw(x_nchw, w_oi, b_o, *, t_hw=2048, compute_dtype=None):
    """nn.Conv2d(Cin, Cout, kernel_size=1) forward on NCHW input (no transposes).

    Args:
      x_nchw:        (N, Cin, H, W) activations.
      w_oi:          (Cout, Cin) — torch Conv2d weight with 1x1 spatial squeezed.
      b_o:           (Cout,) bias.
      t_hw:          lane-axis tile over the flattened H*W dimension.
      compute_dtype: optional (e.g. jnp.bfloat16) MXU compute dtype. The weight
                     is cast in the wrapper (tiny) and x is cast in-kernel;
                     accumulation stays float32.
    Returns:
      (N, Cout, H, W) float32
    """
    n, cin, h, w = x_nchw.shape
    cout, cin_w = w_oi.shape
    assert cin_w == cin
    hw = h * w
    out_dtype = jnp.float32

    # Free reshape (no data movement): keep native NCHW layout, flatten spatial.
    x_flat = x_nchw.reshape(n, cin, hw)
    w_mat = w_oi if compute_dtype is None else w_oi.astype(compute_dtype)
    b_mat = b_o.astype(jnp.float32).reshape(cout, 1)

    # Tile sizing: biggest lane tile that keeps double-buffered activations
    # under ~8 MiB of VMEM; multiple of 128 unless the whole HW axis fits in
    # one tile (then it may be < 128 because it equals the full dim).
    itemsize = jnp.dtype(x_flat.dtype).itemsize
    max_t = max(128, ((8 * 1024 * 1024) // (2 * cin * itemsize)) // 128 * 128)
    t_hw = min(t_hw, max_t)
    if hw <= t_hw:
        t_hw = hw
    else:
        t_hw = max(128, (t_hw // 128) * 128)
    grid = (n, pl.cdiv(hw, t_hw))

    w_size = jnp.dtype(w_mat.dtype).itemsize
    cost = pl.CostEstimate(
        flops=2 * n * hw * cin * cout,
        transcendentals=0,
        bytes_accessed=(n * cin * hw * itemsize          # activations in
                        + cout * cin * w_size            # weights
                        + n * cout * hw * 4),            # output (f32)
    )

    out_flat = pl.pallas_call(
        _pointwise_conv_nchw_kernel,
        out_shape=jax.ShapeDtypeStruct((n, cout, hw), out_dtype),
        grid_spec=pltpu.PrefetchScalarGridSpec(
            num_scalar_prefetch=0,
            grid=grid,
            in_specs=[
                # Batch dim squeezed (None); tile the flattened pixel axis.
                pl.BlockSpec((None, cin, t_hw), lambda i, j: (i, 0, j)),
                # Constant weight / bias blocks (index_map independent of grid
                # so their DMAs are issued once and the buffers are reused).
                pl.BlockSpec((cout, cin), lambda i, j: (0, 0)),
                pl.BlockSpec((cout, 1), lambda i, j: (0, 0)),
            ],
            out_specs=pl.BlockSpec((None, cout, t_hw), lambda i, j: (i, 0, j)),
        ),
        compiler_params=pltpu.CompilerParams(
            dimension_semantics=("parallel", "parallel")),
        cost_estimate=cost,
    )(x_flat, w_mat, b_mat)

    return out_flat.reshape(n, cout, h, w)


class SPPNetPallas:
    """Pallas version of SPPNet's concretely-defined compute (the logits 1x1 conv)."""

    def __init__(self, output_channels=19, key=jax.random.PRNGKey(0)):
        self.output_channels = output_channels
        cin = 256
        kw, kb = jax.random.split(key)
        # Deterministic init mimicking torch Conv2d default U(-1/sqrt(fan_in), ..).
        bound = 1.0 / (cin ** 0.5)
        self.logits_w = jax.random.uniform(
            kw, (output_channels, cin), jnp.float32, -bound, bound)
        self.logits_b = jax.random.uniform(
            kb, (output_channels,), jnp.float32, -bound, bound)

    def forward(self, feat_nchw, *, compute_dtype=None):
        # TODO(synk): x, low_level_feat = encoder(inputs); x = spp(x);
        #             x = decoder(x, low_level_feat)   — external factories.
        # feat_nchw stands for the 256-channel decoder output (N, 256, H, W).
        return pointwise_conv_nchw(
            feat_nchw, self.logits_w, self.logits_b, compute_dtype=compute_dtype)


if __name__ == "__main__":
    key = jax.random.PRNGKey(0)
    k_feat, k_model = jax.random.split(key)

    # Small decoder-output-like feature map: batch=2, channels=256 (fixed by the
    # module's logits layer), spatial 16x16 (H*W = 256, lane-dense).
    x = jax.random.normal(k_feat, (2, 256, 16, 16), jnp.float32)

    model = SPPNetPallas(output_channels=19, key=k_model)

    # f32 path — exact check against plain-JAX reference of Conv2d(256, 19, 1).
    out_f32 = jax.block_until_ready(model.forward(x))
    ref = jnp.einsum("nchw,oc->nohw", x, model.logits_w) + \
        model.logits_b[None, :, None, None]
    assert out_f32.shape == (2, 19, 16, 16)
    assert jnp.allclose(out_f32, ref, atol=1e-4, rtol=1e-4)

    # bf16 compute path (f32 accumulation) — loose tolerance.
    out_bf16 = jax.block_until_ready(model.forward(x, compute_dtype=jnp.bfloat16))
    assert out_bf16.shape == (2, 19, 16, 16)
    assert jnp.allclose(out_bf16, ref, atol=5e-2, rtol=5e-2)

    # Ragged spatial size (H*W not a multiple of the tile) — correctness check.
    x2 = jax.random.normal(k_feat, (1, 256, 17, 13), jnp.float32)
    out2 = jax.block_until_ready(model.forward(x2))
    ref2 = jnp.einsum("nchw,oc->nohw", x2, model.logits_w) + \
        model.logits_b[None, :, None, None]
    assert out2.shape == (1, 19, 17, 13)
    assert jnp.allclose(out2, ref2, atol=1e-4, rtol=1e-4)

    print("KERNEL_OK")
</pallas_src>

<mosaic_0001>
module attributes {stable_mosaic.version = 11 : i64} {
  func.func @_pointwise_conv_nchw_kernel(%arg0: i32, %arg1: i32, %arg2: memref<1x256x256xf32, #tpu.memory_space<vmem>>, %arg3: memref<19x256xf32, #tpu.memory_space<vmem>>, %arg4: memref<19x1xf32, #tpu.memory_space<vmem>>, %arg5: memref<1x19x256xf32, #tpu.memory_space<vmem>>) attributes {dimension_semantics = [#tpu.dimension_semantics<parallel>, #tpu.dimension_semantics<parallel>], iteration_bounds = array<i64: 2, 1>, scalar_prefetch = 0 : i64, scratch_operands = 0 : i64, tpu.core_type = #tpu.core_type<tc>, window_params = [{transform_indices = @transform_0, window_bounds = array<i64: 1, 256, 256>}, {pipeline_mode = #tpu.pipeline_mode<synchronous>, transform_indices = @transform_1, window_bounds = array<i64: 19, 256>}, {pipeline_mode = #tpu.pipeline_mode<synchronous>, transform_indices = @transform_2, window_bounds = array<i64: 19, 1>}, {transform_indices = @transform_3, window_bounds = array<i64: 1, 19, 256>}]} {
    %c0 = arith.constant 0 : index
    %c0_0 = arith.constant 0 : index
    %c0_1 = arith.constant 0 : index
    %0 = vector.load %arg2[%c0, %c0_0, %c0_1] : memref<1x256x256xf32, #tpu.memory_space<vmem>>, vector<1x256x256xf32>
    %1 = vector.shape_cast %0 : vector<1x256x256xf32> to vector<256x256xf32>
    %c0_2 = arith.constant 0 : index
    %c0_3 = arith.constant 0 : index
    %2 = vector.load %arg3[%c0_2, %c0_3] : memref<19x256xf32, #tpu.memory_space<vmem>>, vector<19x256xf32>
    %cst = arith.constant dense<0.000000e+00> : vector<19x256xf32>
    %3 = tpu.matmul %2, %1, %cst {dimension_numbers = #tpu.dot_dimension_numbers<[1], [0], [0], [1], [0, 0, 1, 1], [], []>} : vector<19x256xf32>, vector<256x256xf32>, vector<19x256xf32> -> vector<19x256xf32>
    %c0_4 = arith.constant 0 : index
    %c0_5 = arith.constant 0 : index
    %4 = vector.load %arg4[%c0_4, %c0_5] : memref<19x1xf32, #tpu.memory_space<vmem>>, vector<19x1xf32>
    %5 = vector.broadcast %4 : vector<19x1xf32> to vector<19x256xf32>
    %6 = arith.addf %3, %5 : vector<19x256xf32>
    %c0_6 = arith.constant 0 : index
    %c0_7 = arith.constant 0 : index
    %c0_8 = arith.constant 0 : index
    %7 = vector.load %arg5[%c0_6, %c0_7, %c0_8] : memref<1x19x256xf32, #tpu.memory_space<vmem>>, vector<1x19x256xf32>
    %8 = vector.shape_cast %7 : vector<1x19x256xf32> to vector<19x256xf32>
    %9 = vector.shape_cast %6 : vector<19x256xf32> to vector<1x19x256xf32>
    tpu.vector_store %arg5[%c0_6, %c0_7, %c0_8], %9 {strides = array<i32>} : memref<1x19x256xf32, #tpu.memory_space<vmem>>, vector<1x19x256xf32>,
    return
  }
  func.func @transform_0(%arg0: i32, %arg1: i32) -> (i32, i32, i32) {
    %c0_i32 = arith.constant 0 : i32
    %c0_i32_0 = arith.constant 0 : i32
    return %arg0, %c0_i32, %arg1 : i32, i32, i32
  }
  func.func @transform_1(%arg0: i32, %arg1: i32) -> (i32, i32) {
    %c0_i32 = arith.constant 0 : i32
    %c0_i32_0 = arith.constant 0 : i32
    %c0_i32_1 = arith.constant 0 : i32
    return %c0_i32, %c0_i32_0 : i32, i32
  }
  func.func @transform_2(%arg0: i32, %arg1: i32) -> (i32, i32) {
    %c0_i32 = arith.constant 0 : i32
    %c0_i32_0 = arith.constant 0 : i32
    %c0_i32_1 = arith.constant 0 : i32
    return %c0_i32, %c0_i32_0 : i32, i32
  }
  func.func @transform_3(%arg0: i32, %arg1: i32) -> (i32, i32, i32) {
    %c0_i32 = arith.constant 0 : i32
    %c0_i32_0 = arith.constant 0 : i32
    return %arg0, %c0_i32, %arg1 : i32, i32, i32
  }
}

</mosaic_0001>

<bundles_post_ra>
// kernel: tpu_custom_call.1
= control target key start
LH: loop header
LB: loop body
LE: loop exit
PB: predicated region body
PF: predicated region fallthrough
CT: control target
= control target key end

     0   :  { %8 = vsyncpa [#allocation3], 0  ;;  %s954_s0 = inlined_call_operand.hbm [shape: f32[2,256,256], index: 0, kind: input, shape index: {}]   ;;  %s955_s1 = inlined_call_operand.hbm [shape: f32[19,256], index: 1, kind: input, shape index: {}]   ;;  %s956_s2 = inlined_call_operand.vmem [shape: f32[19,1], index: 2, kind: input, shape index: {}]   ;;  %s957_s3 = inlined_call_operand.vmem [shape: f32[2,19,256], index: 3, kind: output, shape index: {}]  }
   0x1   :  { %10 = vsyncpa [#allocation3 + $0x1], 0 }
   0x2   :  { %11 = vsyncpa [#allocation5], 0  ;;  %s768_s12 = smov 0   ;;  %s770_s13 = smov 0  }
   0x3   :  { %s772_s14 = smov 0   ;;  %s774_s15 = smov 0  }
   0x4   :  { %s776_s16 = smov 0   ;;  %s778_s17 = smov 0  }
   0x5 LB: > { %s541_s18 = sadd.s32 4294967295, %s742_s17   ;;  %p51_p0 = scmp.ne.s32.totalorder %s726_s13, %s722_s12  ;;  %s742_s17 = sphi %s778_s17, %s17_s17   ;;  %s738_s16 = sphi %s776_s16, %s966_s16   ;;  %s734_s15 = sphi %s774_s15, %s965_s15   ;;  %s730_s14 = sphi %s772_s14, %s964_s14   ;;  %s726_s13 = sphi %s770_s13, %s963_s13   ;;  %s722_s12 = sphi %s768_s12, %s962_s12  }
   0x6   : > { %p798_p1 = scmp.eq.s32.totalorder %s541_s18, 0  ;;  %p543_p2 = scmp.ge.s32.totalorder %s742_s17, 1 }
   0x7   : > { %p132_p3 = scmp.lt.s32.totalorder %s742_s17, 3  ;;  %s143_s23 = sshll.u32 %s955_s1, 4  ;;  %s144_s23 = int_to_ptr.hbm [resolvable:$true] %s143_s23 }
   0x8   : > { %p806_p4 = por %p798_p1, %p51_p0  ;;  %s744_s25 = smov [#allocation4]  }
   0x9   : > { %p813_p5 = pnand %p543_p2, %p132_p3  ;;  %s145_s26 = sshll.u32 %s744_s25, 4  ;;  %s146_s26 = int_to_ptr.vmem [resolvable:$true] %s145_s26 }
   0xa   : > { %s745_s27 = smov 256   ;;  %s746_s28 = smov 16  }
   0xb   : > { %p563_p6 = pneg %p813_p5  ;;  %s29_s29 = sadd.s32 1, %s738_s16 }
   0xc   : > { %p31_p8 = scmp.ge.s32.totalorder %s29_s29, 2  ;;  %p45_p9 = scmp.ne.s32.totalorder %s730_s14, %s726_s13 }
   0xd   : > { %p564_p7 = pnand %p563_p6, %p798_p1  ;;  %p46_p10 = scmp.eq.s32.totalorder %s742_s17, 0 }
   0xe   : > { %s968_s29 = smov (%p31_p8, %s29_s29), 0  ;;  %s38_s30 = sadd.s32 1, %s730_s14 }
   0xf   : > { %566 = dma.hbm_to_vmem [thread:$0]  (!%p564_p7), %s144_s23, 768, %s146_s26, [#allocation5], %s745_s27, %s745_s27, %s746_s28  }
  0x10   : > { %p828_p11 = por %p46_p10, %p45_p9  ;;  %s33_s5 = ssub.s32 %s738_s16, %s968_s29 }
  0x11   : > { %s162_s6 = sand.u32 1, %s730_s14   ;;  %p36_p12 = scmp.eq.s32.totalorder %s33_s5, 0 }
  0x12   : > { %p572_p13 = scmp.lt.s32.totalorder %s742_s17, 2  ;;  %s546_s7 = sshll.u32 %s162_s6, 9 }
  0x13   : > { %s555_s8 = sshll.u32 %s738_s16, 9  ;;  %s166_s21 = scalar_lea.vmem [#allocation2], %s546_s7 }
  0x14   : > { %s838_s9 = scalar_select %p36_p12, %s730_s14, %s38_s30  }
  0x15   : > { %s173_s12 = scalar_lea.hbm %s954_s0, %s555_s8  ;;  %s176_s22 = sshll.u32 %s166_s21, 4  ;;  %s177_s22 = int_to_ptr.vmem [resolvable:$true] %s176_s22 }
  0x16   : > { %s174_s18 = sshll.u32 %s173_s12, 4  ;;  %p568_p0 = pnand %p572_p13, %p828_p11  ;;  %s175_s18 = int_to_ptr.hbm [resolvable:$true] %s174_s18 }
  0x17   : > { %s163_s23 = scalar_lea.sflag [#allocation3], %s162_s6  ;;  %188 = sbr.rel (%p813_p5) target bundleno = 216 (0xd8), region = 32 }
  0x18   : > { %570 = dma.hbm_to_vmem [thread:$0]  (!%p568_p0), %s175_s18, 8192, %s177_s22, %s163_s23, %s745_s27, %s745_s27, %s746_s28  }
  0x19   : > { %s190_s25 = sand.u32 (!%p813_p5), 1, %s726_s13  }
  0x1a   : > { %s550_s26 = sshll.u32 (!%p813_p5), %s190_s25, 9  ;;  %s191_s30 = scalar_lea.sflag (!%p813_p5), [#allocation3], %s190_s25 }
  0x1b   : > { %s848_s5 = scalar_lea.vmem (!%p813_p5), [#allocation2], %s550_s26 }
  0x1c   : > { %713 = dma.done.wait (%p806_p4), %s191_s30, 8192  }
  0x1d   : > { %715 = vsyncadd (%p806_p4), %s191_s30, 4294959104 }
  0x1e   : > { %717 = dma.done.wait (%p798_p1), [#allocation5], 768  }
  0x1f   : > { %719 = vsyncadd (%p798_p1), [#allocation5], 4294966528  ;;  %v269_v0 = vld [vmem:[%s848_s5 + $0xf8] sm:$0xff]  ;;  %v267_v1 = vld [vmem:[%s848_s5 + $0xe8] sm:$0xff]  ;;  %p229_p1 = scmp.lt.s32.totalorder %s734_s15, 1 }
  0x20   : > { %v301_v2 = vld [vmem:[%s848_s5 + $0x1f8] sm:$0xff]  ;;  %378 = vmatpush.msra.mxu2 %v269_v0  ;;  %v299_v3 = vld [vmem:[%s848_s5 + $0x1e8] sm:$0xff]  ;;  %v268_v4 = vld [vmem:[%s848_s5 + $0xf0] sm:$0xff] }
  0x21   : > { %404 = vmatpush.msra.mxu3 %v301_v2  ;;  %v265_v5 = vld [vmem:[%s848_s5 + $0xd8] sm:$0xff]  ;;  %326 = vmatpush.msra.mxu0 %v268_v4  ;;  %v266_v7 = vld [vmem:[%s848_s5 + $0xe0] sm:$0xff]  ;;  %v263_v8 = vld [vmem:[%s848_s5 + $0xc8] sm:$0xff]  ;;  %s970_s15 = smov (!%p229_p1, %s734_s15), 1 }
  0x22   : > { %v297_v6 = vld [vmem:[%s848_s5 + $0x1d8] sm:$0xff]  ;;  %379 = vmatpush.msra.mxu2 %v267_v1  ;;  %v300_v9 = vld [vmem:[%s848_s5 + $0x1f0] sm:$0xff]  ;;  %v295_v10 = vld [vmem:[%s848_s5 + $0x1c8] sm:$0xff]  ;;  %s556_s6 = smul.u32 48, %s970_s15 }
  0x23   : > { %405 = vmatpush.msra.mxu3 %v299_v3  ;;  %327 = vmatpush.msra.mxu0 %v266_v7  ;;  %v264_v11 = vld [vmem:[%s848_s5 + $0xd0] sm:$0xff]  ;;  %v298_v12 = vld [vmem:[%s848_s5 + $0x1e0] sm:$0xff]  ;;  %v261_v15 = vld [vmem:[%s848_s5 + $0xb8] sm:$0xff]  ;;  %v747_v3 = vmov 0  }
  0x24   : > { %352 = vmatpush.msra.mxu1 %v300_v9  ;;  %380 = vmatpush.msra.mxu2 %v265_v5  ;;  %v262_v13 = vld [vmem:[%s848_s5 + $0xc0] sm:$0xff]  ;;  %v296_v14 = vld [vmem:[%s848_s5 + $0x1d0] sm:$0xff]  ;;  %v293_v16 = vld [vmem:[%s848_s5 + $0x1b8] sm:$0xff]  ;;  %s236_s10 = scalar_lea.vmem %s957_s3, %s556_s6 }
  0x25   : > { %406 = vmatpush.msra.mxu3 %v297_v6  ;;  %328 = vmatpush.msra.mxu0 %v264_v11  ;;  %v260_v17 = vld [vmem:[%s848_s5 + $0xb0] sm:$0xff]  ;;  %v294_v18 = vld [vmem:[%s848_s5 + $0x1c0] sm:$0xff]  ;;  %v259_v19 = vld [vmem:[%s848_s5 + $0xa8] sm:$0xff] }
  0x26   : > { %353 = vmatpush.msra.mxu1 %v298_v12  ;;  %381 = vmatpush.msra.mxu2 %v263_v8  ;;  %v291_v20 = vld [vmem:[%s848_s5 + $0x1a8] sm:$0xff]  ;;  %v258_v21 = vld [vmem:[%s848_s5 + $0xa0] sm:$0xff]  ;;  %v292_v22 = vld [vmem:[%s848_s5 + $0x1b0] sm:$0xff] }
  0x27   : > { %407 = vmatpush.msra.mxu3 %v295_v10  ;;  %329 = vmatpush.msra.mxu0 %v262_v13  ;;  %v257_v23 = vld [vmem:[%s848_s5 + $0x98] sm:$0xff]  ;;  %v256_v25 = vld [vmem:[%s848_s5 + $0x90] sm:$0xff]  ;;  %v290_v26 = vld [vmem:[%s848_s5 + $0x1a0] sm:$0xff] }
  0x28   : > { %354 = vmatpush.msra.mxu1 %v296_v14  ;;  %382 = vmatpush.msra.mxu2 %v261_v15  ;;  %v289_v24 = vld [vmem:[%s848_s5 + $0x198] sm:$0xff]  ;;  %v255_v27 = vld [vmem:[%s848_s5 + $0x88] sm:$0xff]  ;;  %v254_v29 = vld [vmem:[%s848_s5 + $0x80] sm:$0xff] }
  0x29   : > { %408 = vmatpush.msra.mxu3 %v293_v16  ;;  %330 = vmatpush.msra.mxu0 %v260_v17  ;;  %v287_v28 = vld [vmem:[%s848_s5 + $0x188] sm:$0xff]  ;;  %v288_v30 = vld [vmem:[%s848_s5 + $0x190] sm:$0xff]  ;;  %v253_v31 = vld [vmem:[%s848_s5 + $0x78] sm:$0xff] }
  0x2a   : > { %355 = vmatpush.msra.mxu1 %v294_v18  ;;  %383 = vmatpush.msra.mxu2 %v259_v19  ;;  %v285_v32 = vld [vmem:[%s848_s5 + $0x178] sm:$0xff]  ;;  %v252_v33 = vld [vmem:[%s848_s5 + $0x70] sm:$0xff]  ;;  %v286_v34 = vld [vmem:[%s848_s5 + $0x180] sm:$0xff] }
  0x2b   : > { %409 = vmatpush.msra.mxu3 %v291_v20  ;;  %331 = vmatpush.msra.mxu0 %v258_v21  ;;  %v251_v35 = vld [vmem:[%s848_s5 + $0x68] sm:$0xff]  ;;  %v250_v37 = vld [vmem:[%s848_s5 + $0x60] sm:$0xff]  ;;  %v284_v38 = vld [vmem:[%s848_s5 + $0x170] sm:$0xff] }
  0x2c   : > { %356 = vmatpush.msra.mxu1 %v292_v22  ;;  %384 = vmatpush.msra.mxu2 %v257_v23  ;;  %v283_v36 = vld [vmem:[%s848_s5 + $0x168] sm:$0xff]  ;;  %v249_v39 = vld [vmem:[%s848_s5 + $0x58] sm:$0xff]  ;;  %v248_v41 = vld [vmem:[%s848_s5 + $0x50] sm:$0xff] }
  0x2d   : > { %410 = vmatpush.msra.mxu3 %v289_v24  ;;  %332 = vmatpush.msra.mxu0 %v256_v25  ;;  %v281_v40 = vld [vmem:[%s848_s5 + $0x158] sm:$0xff]  ;;  %v282_v42 = vld [vmem:[%s848_s5 + $0x160] sm:$0xff]  ;;  %v247_v43 = vld [vmem:[%s848_s5 + $0x48] sm:$0xff] }
  0x2e   : > { %357 = vmatpush.msra.mxu1 %v290_v26  ;;  %385 = vmatpush.msra.mxu2 %v255_v27  ;;  %v279_v44 = vld [vmem:[%s848_s5 + $0x148] sm:$0xff]  ;;  %v246_v45 = vld [vmem:[%s848_s5 + $0x40] sm:$0xff]  ;;  %v280_v46 = vld [vmem:[%s848_s5 + $0x150] sm:$0xff] }
  0x2f   : > { %411 = vmatpush.msra.mxu3 %v287_v28  ;;  %333 = vmatpush.msra.mxu0 %v254_v29  ;;  %v245_v47 = vld [vmem:[%s848_s5 + $0x38] sm:$0xff]  ;;  %v244_v49 = vld [vmem:[%s848_s5 + $0x30] sm:$0xff]  ;;  %v278_v50 = vld [vmem:[%s848_s5 + $0x140] sm:$0xff] }
  0x30   : > { %358 = vmatpush.msra.mxu1 %v288_v30  ;;  %386 = vmatpush.msra.mxu2 %v253_v31  ;;  %v277_v48 = vld [vmem:[%s848_s5 + $0x138] sm:$0xff]  ;;  %v243_v51 = vld [vmem:[%s848_s5 + $0x28] sm:$0xff]  ;;  %v242_v53 = vld [vmem:[%s848_s5 + $0x20] sm:$0xff] }
  0x31   : > { %412 = vmatpush.msra.mxu3 %v285_v32  ;;  %334 = vmatpush.msra.mxu0 %v252_v33  ;;  %v275_v52 = vld [vmem:[%s848_s5 + $0x128] sm:$0xff]  ;;  %v276_v54 = vld [vmem:[%s848_s5 + $0x130] sm:$0xff]  ;;  %v241_v55 = vld [vmem:[%s848_s5 + $0x18] sm:$0xff] }
  0x32   : > { %359 = vmatpush.msra.mxu1 %v286_v34  ;;  %387 = vmatpush.msra.mxu2 %v251_v35  ;;  %v273_v56 = vld [vmem:[%s848_s5 + $0x118] sm:$0xff]  ;;  %v240_v57 = vld [vmem:[%s848_s5 + $0x10] sm:$0xff]  ;;  %v274_v58 = vld [vmem:[%s848_s5 + $0x120] sm:$0xff] }
  0x33   : > { %413 = vmatpush.msra.mxu3 %v283_v36  ;;  %335 = vmatpush.msra.mxu0 %v250_v37  ;;  %v239_v59 = vld [vmem:[%s848_s5 + $0x8] sm:$0xff]  ;;  %v302_v61 = vld [vmem:[#allocation4] sm:$0xff]  ;;  %v272_v0 = vld [vmem:[%s848_s5 + $0x110] sm:$0xff] }
  0x34   : > { %360 = vmatpush.msra.mxu1 %v284_v38  ;;  %388 = vmatpush.msra.mxu2 %v249_v39  ;;  %v271_v60 = vld [vmem:[%s848_s5 + $0x108] sm:$0xff]  ;;  %v238_v63 = vld [vmem:[%s848_s5] sm:$0xff]  ;;  %v310_v4 = vld [vmem:[%s956_s2 + $0x10] sm:$0x7] }
  0x35   : > { %414 = vmatpush.msra.mxu3 %v281_v40  ;;  %336 = vmatpush.msra.mxu0 %v248_v41  ;;  %v303_v62 = vld [vmem:[#allocation4 + $0x8] sm:$0xff]  ;;  %v270_v1 = vld [vmem:[%s848_s5 + $0x100] sm:$0xff]  ;;  %v304_v5 = vld [vmem:[#allocation4 + $0x10] sm:$0xff] }
  0x36   : > { %361 = vmatpush.msra.mxu1 %v282_v42  ;;  %389 = vmatpush.msra.mxu2 %v247_v43  ;;  %v308_v2 = vld [vmem:[%s956_s2] sm:$0xff]  ;;  %v305_v6 = vld [vmem:[#allocation4 + $0x18] sm:$0xff]  ;;  %v309_v7 = vld [vmem:[%s956_s2 + $0x8] sm:$0xff] }
  0x37   : > { %415 = vmatpush.msra.mxu3 %v279_v44  ;;  %337 = vmatpush.msra.mxu0 %v246_v45  ;;  %v306_v8 = vld [vmem:[#allocation4 + $0x20] sm:$0x7]  ;;  %v307_v9 = vld [vmem:[#allocation4 + $0x28] sm:$0x7] }
  0x38   : > { %362 = vmatpush.msra.mxu1 %v280_v46  ;;  %390 = vmatpush.msra.mxu2 %v245_v47 }
  0x39   : > { %416 = vmatpush.msra.mxu3 %v277_v48  ;;  %338 = vmatpush.msra.mxu0 %v244_v49 }
  0x3a   : > { %363 = vmatpush.msra.mxu1 %v278_v50  ;;  %391 = vmatpush.msra.mxu2 %v243_v51 }
  0x3b   : > { %417 = vmatpush.msra.mxu3 %v275_v52  ;;  %339 = vmatpush.msra.mxu0 %v242_v53 }
  0x3c   : > { %364 = vmatpush.msra.mxu1 %v276_v54  ;;  %392 = vmatpush.msra.mxu2 %v241_v55 }
  0x3d   : > { %418 = vmatpush.msra.mxu3 %v273_v56  ;;  %340 = vmatpush.msra.mxu0 %v240_v57 }
  0x3e   : > { %365 = vmatpush.msra.mxu1 %v274_v58  ;;  %393 = vmatpush.msra.mxu2 %v239_v59 }
  0x3f   : > { %419 = vmatpush.msra.mxu3 %v271_v60  ;;  %394 = vmatmul.f32.vlgmr.msra.gmra.mxu2 %v302_v61 }
  0x40   : > { %420 = vmatmul.f32.vlgmr.msra.gmra.mxu3 %v303_v62  ;;  %341 = vmatpush.msra.mxu0 %v238_v63 }
  0x41   : > { %366 = vmatpush.msra.mxu1 %v272_v0  ;;  %342 = vmatmul.f32.vlgmr.msra.gmra.mxu0 %v302_v61 }
  0x42   : > { %626 = vset.pattern.permute.xlu0 %v747_v3  ;;  %627 = vset.pattern.permute.xlu1 %v747_v3 }
  0x43   : > { %367 = vmatpush.msra.mxu1 %v270_v1  ;;  %313 = vperm.xlu0 %626, %v308_v2  }
  0x44   : > { %368 = vmatmul.f32.vlgmr.msra.gmra.mxu1 %v303_v62  ;;  %323 = vperm.xlu1 %627, %v310_v4  }
  0x47   : > { %397 = vmatmul.f32.gmra.mxu2 %v304_v5 }
  0x48   : > { %423 = vmatmul.f32.gmra.mxu3 %v305_v6 }
  0x49   : > { %345 = vmatmul.f32.gmra.mxu0 %v304_v5 }
  0x4b   : > { %318 = vperm.xlu0 %626, %v309_v7  }
  0x4c   : > { %371 = vmatmul.f32.gmra.mxu1 %v305_v6 }
  0x4f   : > { %400 = vmatmul.f32.gmra.mxu2 %v306_v8 }
  0x50   : > { %426 = vmatmul.f32.gmra.mxu3 %v307_v9 }
  0x51   : > { %348 = vmatmul.f32.gmra.mxu0 %v306_v8 }
  0x54   : > { %374 = vmatmul.f32.gmra.mxu1 %v307_v9 }
  0xb5   : > { %v314_v10 = vpop.permute.xlu0 %313 }
  0xb6   : > { %v324_v27 = vpop.permute.xlu1 %323 }
  0xbd   : > { %v319_v18 = vpop.permute.xlu0 %318 }
  0xbe   : > { %v343_v11 = vpop.f32.mrf.mxu0 }
  0xbf   : > { %v344_v12 = vadd.f32 %v343_v11, %v314_v10 }
  0xc1   : > { %v369_v13 = vpop.f32.mrf.mxu1 }
  0xc2   : > { %v370_v14 = vadd.f32 %v369_v13, %v344_v12  ;;  %v395_v15 = vpop.f32.mrf.mxu2 }
  0xc3   : > { %v421_v16 = vpop.f32.mrf.mxu3  ;;  %v396_v17 = vadd.f32 %v395_v15, %v314_v10 }
  0xc4   : > { %430 = vst [vmem:[%s236_s10] sm:$0xff] %v370_v14 }
  0xc5   : > { %v422_v19 = vadd.f32 %v421_v16, %v396_v17 }
  0xc6   : > { %v346_v20 = vpop.f32.mrf.mxu0 }
  0xc7   : > { %431 = vst [vmem:[%s236_s10 + $0x8] sm:$0xff] %v422_v19  ;;  %v347_v21 = vadd.f32 %v346_v20, %v319_v18 }
  0xc9   : > { %v372_v22 = vpop.f32.mrf.mxu1 }
  0xca   : > { %v373_v23 = vadd.f32 %v372_v22, %v347_v21  ;;  %v398_v24 = vpop.f32.mrf.mxu2 }
  0xcb   : > { %v424_v25 = vpop.f32.mrf.mxu3  ;;  %v399_v26 = vadd.f32 %v398_v24, %v319_v18 }
  0xcc   : > { %432 = vst [vmem:[%s236_s10 + $0x10] sm:$0xff] %v373_v23 }
  0xcd   : > { %v425_v28 = vadd.f32 %v424_v25, %v399_v26 }
  0xce   : > { %v349_v29 = vpop.f32.mrf.mxu0 }
  0xcf   : > { %433 = vst [vmem:[%s236_s10 + $0x18] sm:$0xff] %v425_v28  ;;  %v350_v30 = vadd.f32 %v349_v29, %v324_v27 }
  0xd1   : > { %v375_v31 = vpop.f32.mrf.mxu1 }
  0xd2   : > { %v376_v32 = vadd.f32 %v375_v31, %v350_v30  ;;  %v401_v33 = vpop.f32.mrf.mxu2 }
  0xd3   : > { %v427_v34 = vpop.f32.mrf.mxu3  ;;  %v402_v35 = vadd.f32 %v401_v33, %v324_v27 }
  0xd4   : > { %434 = vst [vmem:[%s236_s10 + $0x20] sm:$0x7] %v376_v32 }
  0xd5   : > { %v428_v36 = vadd.f32 %v427_v34, %v402_v35 }
  0xd7   : > { %435 = vst [vmem:[%s236_s10 + $0x28] sm:$0x7] %v428_v36 }
  0xd8 PF: > { %s17_s17 = sadd.s32 1, %s742_s17   ;;  %s962_s12 = smov %s726_s13 }
  0xd9   : > { %p14_p2 = scmp.ge.s32.totalorder %s17_s17, 4   ;;  %s963_s13 = smov %s730_s14 }
  0xda   : > { %s964_s14 = smov %s838_s9  ;;  %s965_s15 = smov %s738_s16 }
  0xdb   : > { %s966_s16 = smov %s968_s29  ;;  %16 = sbr.rel (!%p14_p2) target bundleno = 5 (0x5), region = 76 }
  0xe0   :  { %466 = vsyncpa [#allocation3], 1 }
  0xe1   :  { %468 = vsyncpa [#allocation3 + $0x1], 1 }
  0xe2   :  { %469 = vsyncpa [#allocation5], 1 }

</bundles_post_ra>
